<compile_context>
chip_gen: v5e
topology: v5e:2x2
jax: 0.10.0
libtpu: 0.0.40
codegen_flags: <defaults>
</compile_context>

<pallas_src>
import functools

import jax
import jax.numpy as jnp
import numpy as np
from jax import lax
from jax.experimental import pallas as pl
from jax.experimental.pallas import tpu as pltpu


def _scoped_vmem_limit_bytes():
    """Per-generation scoped-VMEM limit: ~96 MiB on v5e/v6e (128 MiB phys),
    ~48 MiB on v7x (64 MiB phys).  Conservative fallback if the query fails."""
    phys = 64 << 20  # assume the smallest (v7x per-core) if we cannot ask
    try:
        phys = int(pltpu.get_tpu_info().vmem_capacity_bytes)
    except Exception:
        pass
    limit = min(max(phys - (16 << 20), 16 << 20), 96 << 20)
    return int(limit)


def _sscl_local_kernel(logits_ref, cid_ref, tid_ref, camids_ref, trackids_ref,
                       loss_ref, hardidx_ref,
                       m_sc, sumexp_sc, sumpos_sc, npos_sc, minval_sc, minidx_sc,
                       iota_sc,
                       *, inv_temperature, loss_scale):
    k = pl.program_id(1)          # M-tile index (reduction axis)
    nk = pl.num_programs(1)

    @pl.when(k == 0)
    def _init():
        m_sc[...] = jnp.full_like(m_sc, -jnp.inf)
        sumexp_sc[...] = jnp.zeros_like(sumexp_sc)
        sumpos_sc[...] = jnp.zeros_like(sumpos_sc)
        npos_sc[...] = jnp.zeros_like(npos_sc)
        minval_sc[...] = jnp.full_like(minval_sc, jnp.inf)
        minidx_sc[...] = jnp.zeros_like(minidx_sc)        # in-range default
        iota_sc[...] = lax.broadcasted_iota(jnp.int32, iota_sc.shape, 1)

    logits = logits_ref[...]                       # [TB, TM] f32 (tail lanes of a
    cid = cid_ref[...]                             #   partial last tile are garbage,
    tid = tid_ref[...]                             #   masked out via sentinel cid/tid)
    camids = camids_ref[...]                       # [TB, 1]  i32
    trackids = trackids_ref[...]                   # [TB, 1]  i32

    TB, TM = logits.shape
    neg_inf = jnp.float32(-jnp.inf)
    pos_inf = jnp.float32(jnp.inf)

    cam_mask = cid == camids                                   # [TB, TM]
    pos_mask = jnp.logical_and(cam_mask, tid == trackids)      # [TB, TM]

    # divide-by-temperature folded into a single multiply; raw logits die here
    scaled = logits * jnp.float32(inv_temperature)

    # ---- online softmax over same-camera slots (numerator shift folded at end)
    masked_scaled = jnp.where(cam_mask, scaled, neg_inf)       # [TB, TM]
    tile_max = jnp.max(masked_scaled, axis=-1, keepdims=True)  # [TB, 1]

    m_old = m_sc[...]
    m_new = jnp.maximum(m_old, tile_max)
    # m_safe avoids (-inf) - (-inf) = NaN when a row has seen no same-cam slot yet.
    m_safe = jnp.where(m_new == neg_inf, 0.0, m_new)
    correction = jnp.where(m_old == m_new, 1.0, jnp.exp(m_old - m_new))   # [TB,1]
    tile_sumexp = jnp.sum(jnp.exp(masked_scaled - m_safe), axis=-1, keepdims=True)
    sumexp_sc[...] = sumexp_sc[...] * correction + tile_sumexp
    m_sc[...] = m_new

    # ---- positives: accumulate un-shifted sums; shift is applied at finalize
    sumpos_sc[...] += jnp.sum(jnp.where(pos_mask, scaled, 0.0),
                              axis=-1, keepdims=True)
    npos_sc[...] += jnp.sum(pos_mask.astype(jnp.float32), axis=-1, keepdims=True)

    # ---- hard positive: first positive slot with minimum similarity.
    #      argmin is invariant under the positive 1/T scale, so reuse `scaled`.
    masked_for_min = jnp.where(pos_mask, scaled, pos_inf)       # [TB, TM]
    tile_min = jnp.min(masked_for_min, axis=-1, keepdims=True)  # [TB, 1]
    cand = jnp.where(masked_for_min == tile_min, iota_sc[...], jnp.int32(TM))
    tile_idx = jnp.min(cand, axis=-1, keepdims=True) + k * TM   # [TB,1] global idx
    minval_old = minval_sc[...]
    take_tile = tile_min < minval_old                           # strict < keeps first
    minidx_sc[...] = jnp.where(take_tile, tile_idx, minidx_sc[...])
    minval_sc[...] = jnp.minimum(minval_old, tile_min)

    @pl.when(k == nk - 1)
    def _finalize():
        n_pos = npos_sc[...]
        has_pos = n_pos > 0.0
        denom = jnp.where(has_pos, n_pos, 1.0)
        # mean over positives of (s_j - lmax) - log(sum_cam exp(s - lmax))
        mean_log_prob = (sumpos_sc[...] / denom) - m_sc[...] - jnp.log(sumexp_sc[...])
        loss_ref[...] = jnp.where(has_pos,
                                  jnp.float32(-loss_scale) * mean_log_prob,
                                  jnp.float32(0.0))
        hardidx_ref[...] = minidx_sc[...]


def ctam_sscl_loss_local(logits, mem, mem_cid, mem_tid, camids, trackids,
                         temperature=0.07, base_temperature=0.07, tile_m=None):
    """Pallas implementation of CTAM_SSCL_Loss.forward(..., type='local').

    tile_m=None  -> auto-size the M tile from the scoped-VMEM budget.
    """
    B, M = logits.shape

    # ---- anchor-axis split: give the "parallel" grid axis 2 blocks when the
    #      batch allows it, so a 2-TensorCore chip (v7x) can shard anchors.
    if B >= 16 and B % 16 == 0:
        TB = B // 2
    else:
        TB = B
    num_b_blocks = B // TB

    m_aligned = ((M + 127) // 128) * 128
    vmem_limit = _scoped_vmem_limit_bytes()

    if tile_m is None:
        data_budget = int(vmem_limit * 0.85)
        # per-lane bytes: double-buffered logits (2*TB*4) + cid/tid (2*2*4)
        # + lane-iota scratch (8 sublanes * 4)
        bytes_per_lane = 8 * TB + 48
        tm_budget = (data_budget // bytes_per_lane // 128) * 128
        TM = max(128, min(m_aligned, 16384, tm_budget))
    else:
        TM = ((min(int(tile_m), m_aligned) + 127) // 128) * 128
        TM = max(128, TM)

    num_m_tiles = (M + TM - 1) // TM
    M_pad = num_m_tiles * TM

    # logits are streamed as-is: NO wrapper-side pad copy of the [B, M] array.
    # A partial last tile reads past the array edge; those lanes are dead because
    # the sentinel-padded cid/tid below make cam_mask/pos_mask False there.
    logits_f = logits if logits.dtype == jnp.float32 else logits.astype(jnp.float32)
    cid_2d = mem_cid.reshape(1, M).astype(jnp.int32)
    tid_2d = mem_tid.reshape(1, M).astype(jnp.int32)
    camids_2d = camids.reshape(B, 1).astype(jnp.int32)
    trackids_2d = trackids.reshape(B, 1).astype(jnp.int32)
    if M_pad != M:
        pad = M_pad - M
        sentinel = jnp.iinfo(jnp.int32).min  # never equals a real cam/track id
        cid_2d = jnp.pad(cid_2d, ((0, 0), (0, pad)), constant_values=sentinel)
        tid_2d = jnp.pad(tid_2d, ((0, 0), (0, pad)), constant_values=sentinel)

    kernel = functools.partial(
        _sscl_local_kernel,
        inv_temperature=1.0 / temperature,
        loss_scale=temperature / base_temperature)

    loss_pa, hard_idx = pl.pallas_call(
        kernel,
        out_shape=(jax.ShapeDtypeStruct((B, 1), jnp.float32),
                   jax.ShapeDtypeStruct((B, 1), jnp.int32)),
        grid_spec=pltpu.PrefetchScalarGridSpec(
            num_scalar_prefetch=0,
            grid=(num_b_blocks, num_m_tiles),
            in_specs=[
                pl.BlockSpec((TB, TM), lambda b, k: (b, k)),   # logits tile
                pl.BlockSpec((1, TM), lambda b, k: (0, k)),    # mem_CID tile
                pl.BlockSpec((1, TM), lambda b, k: (0, k)),    # mem_TID tile
                pl.BlockSpec((TB, 1), lambda b, k: (b, 0)),    # camids
                pl.BlockSpec((TB, 1), lambda b, k: (b, 0)),    # trackids
            ],
            out_specs=(
                pl.BlockSpec((TB, 1), lambda b, k: (b, 0)),    # loss per anchor
                pl.BlockSpec((TB, 1), lambda b, k: (b, 0)),    # hard-positive index
            ),
            scratch_shapes=[pltpu.VMEM((TB, 1), jnp.float32)] * 5     # m, sumexp,
                          + [pltpu.VMEM((TB, 1), jnp.int32),          # sumpos, npos,
                             pltpu.VMEM((1, TM), jnp.int32)],         # minval; minidx; iota
        ),
        compiler_params=pltpu.CompilerParams(
            dimension_semantics=("parallel", "arbitrary"),
            vmem_limit_bytes=int(vmem_limit)),
    )(logits_f, cid_2d, tid_2d, camids_2d, trackids_2d)

    loss = jnp.mean(loss_pa)
    # Gather the B hard-positive rows directly from the memory bank (index gather;
    # the bank never passes through the kernel / VMEM).  Clamp for safety in the
    # degenerate no-positive case.
    safe_idx = jnp.clip(hard_idx[:, 0], 0, M - 1)
    hard_pos = jnp.take(mem, safe_idx, axis=0)
    return loss, hard_pos


def _reference_local(logits, mem, mem_cid, mem_tid, camids, trackids,
                     temperature=0.07, base_temperature=0.07):
    logits = np.asarray(logits, np.float64)
    mem = np.asarray(mem, np.float64)
    mem_cid = np.asarray(mem_cid)
    mem_tid = np.asarray(mem_tid)
    losses, hps = [], []
    for i in range(logits.shape[0]):
        cam_sel = mem_cid == camids[i]
        cam_logit = logits[i][cam_sel]
        tid_list = mem_tid[cam_sel]
        pos_sel = tid_list == trackids[i]
        hard_idx = int(np.argmin(cam_logit[pos_sel]))
        hps.append(mem[cam_sel][pos_sel][hard_idx])
        adc = cam_logit / temperature
        adc = adc - adc.max()
        positive = adc[pos_sel]
        n_pos = positive.shape[0]
        log_prob = positive - np.log(np.exp(adc).sum())
        mlp = log_prob.sum() / n_pos
        losses.append(-(temperature / base_temperature) * mlp)
    return np.mean(losses), np.stack(hps)


if __name__ == "__main__":
    def run_case(B, M, D, tile_m, n_cams=4, n_tracks=8):
        key = jax.random.PRNGKey(0)
        k_mem, k_q, k_cid, k_tid = jax.random.split(key, 4)

        mem = jax.random.normal(k_mem, (M, D), dtype=jnp.float32)
        mem = mem / jnp.linalg.norm(mem, axis=-1, keepdims=True)
        q = jax.random.normal(k_q, (B, D), dtype=jnp.float32)
        q = q / jnp.linalg.norm(q, axis=-1, keepdims=True)
        logits = q @ mem.T                                    # [B, M] similarities

        mem_cid = jax.random.randint(k_cid, (M,), 0, n_cams, dtype=jnp.int32)
        mem_tid = jax.random.randint(k_tid, (M,), 0, n_tracks, dtype=jnp.int32)
        # anchor (cam, track) pairs taken from existing slots -> >=1 positive each
        camids = mem_cid[:B]
        trackids = mem_tid[:B]

        loss, hard_pos = ctam_sscl_loss_local(logits, mem, mem_cid, mem_tid,
                                              camids, trackids, tile_m=tile_m)
        loss = jax.block_until_ready(loss)
        hard_pos = jax.block_until_ready(hard_pos)

        ref_loss, ref_hp = _reference_local(np.asarray(logits), np.asarray(mem),
                                            np.asarray(mem_cid), np.asarray(mem_tid),
                                            np.asarray(camids), np.asarray(trackids))
        np.testing.assert_allclose(float(loss), ref_loss, rtol=1e-4, atol=1e-4)
        np.testing.assert_allclose(np.asarray(hard_pos), ref_hp, rtol=1e-5, atol=1e-5)

    # Case 1: forced small tile -> multi-tile online softmax + partial last logits
    #         tile that reads past the (unpadded) array edge.
    run_case(B=8, M=320, D=128, tile_m=128)
    # Case 2: auto tile sizing from the VMEM budget + 2 anchor blocks
    #         (megacore-shardable "parallel" axis on v7x).
    run_case(B=16, M=320, D=128, tile_m=None)

    print("KERNEL_OK")
</pallas_src>

<mosaic_0001>
module attributes {stable_mosaic.version = 11 : i64} {
  func.func @_sscl_local_kernel(%arg0: i32, %arg1: i32, %arg2: memref<8x128xf32, #tpu.memory_space<vmem>>, %arg3: memref<1x128xi32, #tpu.memory_space<vmem>>, %arg4: memref<1x128xi32, #tpu.memory_space<vmem>>, %arg5: memref<8x1xi32, #tpu.memory_space<vmem>>, %arg6: memref<8x1xi32, #tpu.memory_space<vmem>>, %arg7: memref<8x1xf32, #tpu.memory_space<vmem>>, %arg8: memref<8x1xi32, #tpu.memory_space<vmem>>, %arg9: memref<8x1xf32, #tpu.memory_space<vmem>>, %arg10: memref<8x1xf32, #tpu.memory_space<vmem>>, %arg11: memref<8x1xf32, #tpu.memory_space<vmem>>, %arg12: memref<8x1xf32, #tpu.memory_space<vmem>>, %arg13: memref<8x1xf32, #tpu.memory_space<vmem>>, %arg14: memref<8x1xi32, #tpu.memory_space<vmem>>, %arg15: memref<1x128xi32, #tpu.memory_space<vmem>>) attributes {dimension_semantics = [#tpu.dimension_semantics<parallel>, #tpu.dimension_semantics<arbitrary>], iteration_bounds = array<i64: 1, 3>, scalar_prefetch = 0 : i64, scratch_operands = 7 : i64, tpu.core_type = #tpu.core_type<tc>, window_params = [{transform_indices = @transform_0, window_bounds = array<i64: 8, 128>}, {transform_indices = @transform_1, window_bounds = array<i64: 1, 128>}, {transform_indices = @transform_2, window_bounds = array<i64: 1, 128>}, {transform_indices = @transform_3, window_bounds = array<i64: 8, 1>}, {transform_indices = @transform_4, window_bounds = array<i64: 8, 1>}, {transform_indices = @transform_5, window_bounds = array<i64: 8, 1>}, {transform_indices = @transform_6, window_bounds = array<i64: 8, 1>}]} {
    %c0_i32 = arith.constant 0 : i32
    %0 = arith.cmpi eq, %arg1, %c0_i32 : i32
    %1 = arith.extui %0 : i1 to i32
    %c0_i32_0 = arith.constant 0 : i32
    %2 = arith.cmpi ne, %1, %c0_i32_0 : i32
    scf.if %2 {
      %cst_50 = arith.constant 0xFF800000 : f32
      %82 = vector.broadcast %cst_50 : f32 to vector<8x1xf32>
      %c0_51 = arith.constant 0 : index
      %c0_52 = arith.constant 0 : index
      %83 = vector.load %arg9[%c0_51, %c0_52] : memref<8x1xf32, #tpu.memory_space<vmem>>, vector<8x1xf32>
      tpu.vector_store %arg9[%c0_51, %c0_52], %82 {strides = array<i32>} : memref<8x1xf32, #tpu.memory_space<vmem>>, vector<8x1xf32>,
      %cst_53 = arith.constant 0.000000e+00 : f32
      %84 = vector.broadcast %cst_53 : f32 to vector<8x1xf32>
      %c0_54 = arith.constant 0 : index
      %c0_55 = arith.constant 0 : index
      %85 = vector.load %arg10[%c0_54, %c0_55] : memref<8x1xf32, #tpu.memory_space<vmem>>, vector<8x1xf32>
      tpu.vector_store %arg10[%c0_54, %c0_55], %84 {strides = array<i32>} : memref<8x1xf32, #tpu.memory_space<vmem>>, vector<8x1xf32>,
      %cst_56 = arith.constant 0.000000e+00 : f32
      %86 = vector.broadcast %cst_56 : f32 to vector<8x1xf32>
      %c0_57 = arith.constant 0 : index
      %c0_58 = arith.constant 0 : index
      %87 = vector.load %arg11[%c0_57, %c0_58] : memref<8x1xf32, #tpu.memory_space<vmem>>, vector<8x1xf32>
      tpu.vector_store %arg11[%c0_57, %c0_58], %86 {strides = array<i32>} : memref<8x1xf32, #tpu.memory_space<vmem>>, vector<8x1xf32>,
      %cst_59 = arith.constant 0.000000e+00 : f32
      %88 = vector.broadcast %cst_59 : f32 to vector<8x1xf32>
      %c0_60 = arith.constant 0 : index
      %c0_61 = arith.constant 0 : index
      %89 = vector.load %arg12[%c0_60, %c0_61] : memref<8x1xf32, #tpu.memory_space<vmem>>, vector<8x1xf32>
      tpu.vector_store %arg12[%c0_60, %c0_61], %88 {strides = array<i32>} : memref<8x1xf32, #tpu.memory_space<vmem>>, vector<8x1xf32>,
      %cst_62 = arith.constant 0x7F800000 : f32
      %90 = vector.broadcast %cst_62 : f32 to vector<8x1xf32>
      %c0_63 = arith.constant 0 : index
      %c0_64 = arith.constant 0 : index
      %91 = vector.load %arg13[%c0_63, %c0_64] : memref<8x1xf32, #tpu.memory_space<vmem>>, vector<8x1xf32>
      tpu.vector_store %arg13[%c0_63, %c0_64], %90 {strides = array<i32>} : memref<8x1xf32, #tpu.memory_space<vmem>>, vector<8x1xf32>,
      %c0_i32_65 = arith.constant 0 : i32
      %92 = vector.broadcast %c0_i32_65 : i32 to vector<8x1xi32>
      %c0_66 = arith.constant 0 : index
      %c0_67 = arith.constant 0 : index
      %93 = vector.load %arg14[%c0_66, %c0_67] : memref<8x1xi32, #tpu.memory_space<vmem>>, vector<8x1xi32>
      tpu.vector_store %arg14[%c0_66, %c0_67], %92 {strides = array<i32>} : memref<8x1xi32, #tpu.memory_space<vmem>>, vector<8x1xi32>,
      %94 = tpu.iota {dimensions = array<i32: 1>} : vector<1x128xi32>
      %c0_68 = arith.constant 0 : index
      %c0_69 = arith.constant 0 : index
      %95 = vector.load %arg15[%c0_68, %c0_69] : memref<1x128xi32, #tpu.memory_space<vmem>>, vector<1x128xi32>
      tpu.vector_store %arg15[%c0_68, %c0_69], %94 {strides = array<i32>} : memref<1x128xi32, #tpu.memory_space<vmem>>, vector<1x128xi32>,
    } else {
    }
    %c0 = arith.constant 0 : index
    %c0_1 = arith.constant 0 : index
    %3 = vector.load %arg2[%c0, %c0_1] : memref<8x128xf32, #tpu.memory_space<vmem>>, vector<8x128xf32>
    %c0_2 = arith.constant 0 : index
    %c0_3 = arith.constant 0 : index
    %4 = vector.load %arg3[%c0_2, %c0_3] : memref<1x128xi32, #tpu.memory_space<vmem>>, vector<1x128xi32>
    %c0_4 = arith.constant 0 : index
    %c0_5 = arith.constant 0 : index
    %5 = vector.load %arg4[%c0_4, %c0_5] : memref<1x128xi32, #tpu.memory_space<vmem>>, vector<1x128xi32>
    %c0_6 = arith.constant 0 : index
    %c0_7 = arith.constant 0 : index
    %6 = vector.load %arg5[%c0_6, %c0_7] : memref<8x1xi32, #tpu.memory_space<vmem>>, vector<8x1xi32>
    %c0_8 = arith.constant 0 : index
    %c0_9 = arith.constant 0 : index
    %7 = vector.load %arg6[%c0_8, %c0_9] : memref<8x1xi32, #tpu.memory_space<vmem>>, vector<8x1xi32>
    %8 = vector.broadcast %4 : vector<1x128xi32> to vector<8x128xi32>
    %9 = vector.broadcast %6 : vector<8x1xi32> to vector<8x128xi32>
    %10 = arith.cmpi eq, %8, %9 : vector<8x128xi32>
    %11 = vector.broadcast %5 : vector<1x128xi32> to vector<8x128xi32>
    %12 = vector.broadcast %7 : vector<8x1xi32> to vector<8x128xi32>
    %13 = arith.cmpi eq, %11, %12 : vector<8x128xi32>
    %14 = arith.andi %10, %13 : vector<8x128xi1>
    %cst = arith.constant 14.2857141 : f32
    %15 = vector.broadcast %cst : f32 to vector<8x128xf32>
    %16 = arith.mulf %3, %15 : vector<8x128xf32>
    %cst_10 = arith.constant 0xFF800000 : f32
    %17 = vector.broadcast %cst_10 : f32 to vector<8x128xf32>
    %18 = arith.select %10, %16, %17 : vector<8x128xi1>, vector<8x128xf32>
    %cst_11 = arith.constant dense<0xFF800000> : vector<8xf32>
    %19 = vector.multi_reduction <maximumf>, %18, %cst_11 [1] : vector<8x128xf32> to vector<8xf32>
    %20 = vector.shape_cast %19 : vector<8xf32> to vector<8x1xf32>
    %c0_12 = arith.constant 0 : index
    %c0_13 = arith.constant 0 : index
    %21 = vector.load %arg9[%c0_12, %c0_13] : memref<8x1xf32, #tpu.memory_space<vmem>>, vector<8x1xf32>
    %22 = arith.maximumf %21, %20 : vector<8x1xf32>
    %cst_14 = arith.constant 0xFF800000 : f32
    %23 = vector.broadcast %cst_14 : f32 to vector<8x1xf32>
    %24 = arith.cmpf oeq, %22, %23 : vector<8x1xf32>
    %cst_15 = arith.constant 0.000000e+00 : f32
    %25 = vector.broadcast %cst_15 : f32 to vector<8x1xf32>
    %26 = arith.select %24, %25, %22 : vector<8x1xi1>, vector<8x1xf32>
    %27 = arith.cmpf oeq, %21, %22 : vector<8x1xf32>
    %28 = arith.subf %21, %22 : vector<8x1xf32>
    %29 = math.exp %28 : vector<8x1xf32>
    %cst_16 = arith.constant 1.000000e+00 : f32
    %30 = vector.broadcast %cst_16 : f32 to vector<8x1xf32>
    %31 = arith.select %27, %30, %29 : vector<8x1xi1>, vector<8x1xf32>
    %32 = vector.broadcast %26 : vector<8x1xf32> to vector<8x128xf32>
    %33 = arith.subf %18, %32 : vector<8x128xf32>
    %34 = math.exp %33 : vector<8x128xf32>
    %cst_17 = arith.constant dense<0.000000e+00> : vector<8xf32>
    %35 = vector.multi_reduction <add>, %34, %cst_17 [1] : vector<8x128xf32> to vector<8xf32>
    %36 = vector.shape_cast %35 : vector<8xf32> to vector<8x1xf32>
    %c0_18 = arith.constant 0 : index
    %c0_19 = arith.constant 0 : index
    %37 = vector.load %arg10[%c0_18, %c0_19] : memref<8x1xf32, #tpu.memory_space<vmem>>, vector<8x1xf32>
    %38 = arith.mulf %37, %31 : vector<8x1xf32>
    %39 = arith.addf %38, %36 : vector<8x1xf32>
    %c0_20 = arith.constant 0 : index
    %c0_21 = arith.constant 0 : index
    %40 = vector.load %arg10[%c0_20, %c0_21] : memref<8x1xf32, #tpu.memory_space<vmem>>, vector<8x1xf32>
    tpu.vector_store %arg10[%c0_20, %c0_21], %39 {strides = array<i32>} : memref<8x1xf32, #tpu.memory_space<vmem>>, vector<8x1xf32>,
    %c0_22 = arith.constant 0 : index
    %c0_23 = arith.constant 0 : index
    %41 = vector.load %arg9[%c0_22, %c0_23] : memref<8x1xf32, #tpu.memory_space<vmem>>, vector<8x1xf32>
    tpu.vector_store %arg9[%c0_22, %c0_23], %22 {strides = array<i32>} : memref<8x1xf32, #tpu.memory_space<vmem>>, vector<8x1xf32>,
    %c0_24 = arith.constant 0 : index
    %c0_25 = arith.constant 0 : index
    %42 = vector.load %arg11[%c0_24, %c0_25] : memref<8x1xf32, #tpu.memory_space<vmem>>, vector<8x1xf32>
    %cst_26 = arith.constant 0.000000e+00 : f32
    %43 = vector.broadcast %cst_26 : f32 to vector<8x128xf32>
    %44 = arith.select %14, %16, %43 : vector<8x128xi1>, vector<8x128xf32>
    %cst_27 = arith.constant dense<0.000000e+00> : vector<8xf32>
    %45 = vector.multi_reduction <add>, %44, %cst_27 [1] : vector<8x128xf32> to vector<8xf32>
    %46 = vector.shape_cast %45 : vector<8xf32> to vector<8x1xf32>
    %47 = arith.addf %42, %46 : vector<8x1xf32>
    %c0_28 = arith.constant 0 : index
    %c0_29 = arith.constant 0 : index
    %48 = vector.load %arg11[%c0_28, %c0_29] : memref<8x1xf32, #tpu.memory_space<vmem>>, vector<8x1xf32>
    tpu.vector_store %arg11[%c0_28, %c0_29], %47 {strides = array<i32>} : memref<8x1xf32, #tpu.memory_space<vmem>>, vector<8x1xf32>,
    %c0_30 = arith.constant 0 : index
    %c0_31 = arith.constant 0 : index
    %49 = vector.load %arg12[%c0_30, %c0_31] : memref<8x1xf32, #tpu.memory_space<vmem>>, vector<8x1xf32>
    %50 = arith.extui %14 : vector<8x128xi1> to vector<8x128xi32>
    %51 = arith.sitofp %50 : vector<8x128xi32> to vector<8x128xf32>
    %cst_32 = arith.constant dense<0.000000e+00> : vector<8xf32>
    %52 = vector.multi_reduction <add>, %51, %cst_32 [1] : vector<8x128xf32> to vector<8xf32>
    %53 = vector.shape_cast %52 : vector<8xf32> to vector<8x1xf32>
    %54 = arith.addf %49, %53 : vector<8x1xf32>
    %c0_33 = arith.constant 0 : index
    %c0_34 = arith.constant 0 : index
    %55 = vector.load %arg12[%c0_33, %c0_34] : memref<8x1xf32, #tpu.memory_space<vmem>>, vector<8x1xf32>
    tpu.vector_store %arg12[%c0_33, %c0_34], %54 {strides = array<i32>} : memref<8x1xf32, #tpu.memory_space<vmem>>, vector<8x1xf32>,
    %cst_35 = arith.constant 0x7F800000 : f32
    %56 = vector.broadcast %cst_35 : f32 to vector<8x128xf32>
    %57 = arith.select %14, %16, %56 : vector<8x128xi1>, vector<8x128xf32>
    %cst_36 = arith.constant dense<0x7F800000> : vector<8xf32>
    %58 = vector.multi_reduction <minimumf>, %57, %cst_36 [1] : vector<8x128xf32> to vector<8xf32>
    %59 = vector.shape_cast %58 : vector<8xf32> to vector<8x1xf32>
    %60 = vector.broadcast %59 : vector<8x1xf32> to vector<8x128xf32>
    %61 = arith.cmpf oeq, %57, %60 : vector<8x128xf32>
    %c0_37 = arith.constant 0 : index
    %c0_38 = arith.constant 0 : index
    %62 = vector.load %arg15[%c0_37, %c0_38] : memref<1x128xi32, #tpu.memory_space<vmem>>, vector<1x128xi32>
    %c128_i32 = arith.constant 128 : i32
    %63 = vector.shape_cast %62 : vector<1x128xi32> to vector<1x128xi32>
    %64 = vector.broadcast %63 : vector<1x128xi32> to vector<8x128xi32>
    %65 = vector.broadcast %c128_i32 : i32 to vector<8x128xi32>
    %66 = arith.select %61, %64, %65 : vector<8x128xi1>, vector<8x128xi32>
    %cst_39 = arith.constant dense<2147483647> : vector<8xi32>
    %67 = vector.multi_reduction <minsi>, %66, %cst_39 [1] : vector<8x128xi32> to vector<8xi32>
    %68 = vector.shape_cast %67 : vector<8xi32> to vector<8x1xi32>
    %c128_i32_40 = arith.constant 128 : i32
    %69 = arith.muli %arg1, %c128_i32_40 : i32
    %70 = vector.broadcast %69 : i32 to vector<8x1xi32>
    %71 = arith.addi %68, %70 : vector<8x1xi32>
    %c0_41 = arith.constant 0 : index
    %c0_42 = arith.constant 0 : index
    %72 = vector.load %arg13[%c0_41, %c0_42] : memref<8x1xf32, #tpu.memory_space<vmem>>, vector<8x1xf32>
    %73 = arith.cmpf olt, %59, %72 : vector<8x1xf32>
    %c0_43 = arith.constant 0 : index
    %c0_44 = arith.constant 0 : index
    %74 = vector.load %arg14[%c0_43, %c0_44] : memref<8x1xi32, #tpu.memory_space<vmem>>, vector<8x1xi32>
    %75 = arith.select %73, %71, %74 : vector<8x1xi1>, vector<8x1xi32>
    %c0_45 = arith.constant 0 : index
    %c0_46 = arith.constant 0 : index
    %76 = vector.load %arg14[%c0_45, %c0_46] : memref<8x1xi32, #tpu.memory_space<vmem>>, vector<8x1xi32>
    tpu.vector_store %arg14[%c0_45, %c0_46], %75 {strides = array<i32>} : memref<8x1xi32, #tpu.memory_space<vmem>>, vector<8x1xi32>,
    %77 = arith.minimumf %72, %59 : vector<8x1xf32>
    %c0_47 = arith.constant 0 : index
    %c0_48 = arith.constant 0 : index
    %78 = vector.load %arg13[%c0_47, %c0_48] : memref<8x1xf32, #tpu.memory_space<vmem>>, vector<8x1xf32>
    tpu.vector_store %arg13[%c0_47, %c0_48], %77 {strides = array<i32>} : memref<8x1xf32, #tpu.memory_space<vmem>>, vector<8x1xf32>,
    %c2_i32 = arith.constant 2 : i32
    %79 = arith.cmpi eq, %arg1, %c2_i32 : i32
    %80 = arith.extui %79 : i1 to i32
    %c0_i32_49 = arith.constant 0 : i32
    %81 = arith.cmpi ne, %80, %c0_i32_49 : i32
    scf.if %81 {
      %c0_50 = arith.constant 0 : index
      %c0_51 = arith.constant 0 : index
      %82 = vector.load %arg12[%c0_50, %c0_51] : memref<8x1xf32, #tpu.memory_space<vmem>>, vector<8x1xf32>
      %cst_52 = arith.constant 0.000000e+00 : f32
      %83 = vector.broadcast %cst_52 : f32 to vector<8x1xf32>
      %84 = arith.cmpf ogt, %82, %83 : vector<8x1xf32>
      %cst_53 = arith.constant 1.000000e+00 : f32
      %85 = vector.broadcast %cst_53 : f32 to vector<8x1xf32>
      %86 = arith.select %84, %82, %85 : vector<8x1xi1>, vector<8x1xf32>
      %c0_54 = arith.constant 0 : index
      %c0_55 = arith.constant 0 : index
      %87 = vector.load %arg11[%c0_54, %c0_55] : memref<8x1xf32, #tpu.memory_space<vmem>>, vector<8x1xf32>
      %88 = arith.divf %87, %86 : vector<8x1xf32>
      %c0_56 = arith.constant 0 : index
      %c0_57 = arith.constant 0 : index
      %89 = vector.load %arg9[%c0_56, %c0_57] : memref<8x1xf32, #tpu.memory_space<vmem>>, vector<8x1xf32>
      %90 = arith.subf %88, %89 : vector<8x1xf32>
      %c0_58 = arith.constant 0 : index
      %c0_59 = arith.constant 0 : index
      %91 = vector.load %arg10[%c0_58, %c0_59] : memref<8x1xf32, #tpu.memory_space<vmem>>, vector<8x1xf32>
      %92 = math.log %91 : vector<8x1xf32>
      %93 = arith.subf %90, %92 : vector<8x1xf32>
      %cst_60 = arith.constant -1.000000e+00 : f32
      %94 = vector.broadcast %cst_60 : f32 to vector<8x1xf32>
      %95 = arith.mulf %94, %93 : vector<8x1xf32>
      %cst_61 = arith.constant 0.000000e+00 : f32
      %96 = vector.broadcast %cst_61 : f32 to vector<8x1xf32>
      %97 = arith.select %84, %95, %96 : vector<8x1xi1>, vector<8x1xf32>
      %c0_62 = arith.constant 0 : index
      %c0_63 = arith.constant 0 : index
      %98 = vector.load %arg7[%c0_62, %c0_63] : memref<8x1xf32, #tpu.memory_space<vmem>>, vector<8x1xf32>
      tpu.vector_store %arg7[%c0_62, %c0_63], %97 {strides = array<i32>} : memref<8x1xf32, #tpu.memory_space<vmem>>, vector<8x1xf32>,
      %c0_64 = arith.constant 0 : index
      %c0_65 = arith.constant 0 : index
      %99 = vector.load %arg14[%c0_64, %c0_65] : memref<8x1xi32, #tpu.memory_space<vmem>>, vector<8x1xi32>
      %c0_66 = arith.constant 0 : index
      %c0_67 = arith.constant 0 : index
      %100 = vector.load %arg8[%c0_66, %c0_67] : memref<8x1xi32, #tpu.memory_space<vmem>>, vector<8x1xi32>
      tpu.vector_store %arg8[%c0_66, %c0_67], %99 {strides = array<i32>} : memref<8x1xi32, #tpu.memory_space<vmem>>, vector<8x1xi32>,
    } else {
    }
    return
  }
  func.func @transform_0(%arg0: i32, %arg1: i32) -> (i32, i32) {
    %c0_i32 = arith.constant 0 : i32
    return %arg0, %arg1 : i32, i32
  }
  func.func @transform_1(%arg0: i32, %arg1: i32) -> (i32, i32) {
    %c0_i32 = arith.constant 0 : i32
    %c0_i32_0 = arith.constant 0 : i32
    return %c0_i32, %arg1 : i32, i32
  }
  func.func @transform_2(%arg0: i32, %arg1: i32) -> (i32, i32) {
    %c0_i32 = arith.constant 0 : i32
    %c0_i32_0 = arith.constant 0 : i32
    return %c0_i32, %arg1 : i32, i32
  }
  func.func @transform_3(%arg0: i32, %arg1: i32) -> (i32, i32) {
    %c0_i32 = arith.constant 0 : i32
    %c0_i32_0 = arith.constant 0 : i32
    return %arg0, %c0_i32 : i32, i32
  }
  func.func @transform_4(%arg0: i32, %arg1: i32) -> (i32, i32) {
    %c0_i32 = arith.constant 0 : i32
    %c0_i32_0 = arith.constant 0 : i32
    return %arg0, %c0_i32 : i32, i32
  }
  func.func @transform_5(%arg0: i32, %arg1: i32) -> (i32, i32) {
    %c0_i32 = arith.constant 0 : i32
    %c0_i32_0 = arith.constant 0 : i32
    return %arg0, %c0_i32 : i32, i32
  }
  func.func @transform_6(%arg0: i32, %arg1: i32) -> (i32, i32) {
    %c0_i32 = arith.constant 0 : i32
    %c0_i32_0 = arith.constant 0 : i32
    return %arg0, %c0_i32 : i32, i32
  }
}

</mosaic_0001>

<bundles_post_ra>
// kernel: tpu_custom_call.1
= control target key start
LH: loop header
LB: loop body
LE: loop exit
PB: predicated region body
PF: predicated region fallthrough
CT: control target
= control target key end

     0   :  { %12 = vsyncpa [#allocation10], 0  ;;  %s998_s0 = inlined_call_operand.hbm [shape: f32[8,320], index: 0, kind: input, shape index: {}]   ;;  %s999_s1 = inlined_call_operand.vmem [shape: s32[1,384], index: 1, kind: input, shape index: {}]   ;;  %s1000_s2 = inlined_call_operand.vmem [shape: s32[1,384], index: 2, kind: input, shape index: {}]   ;;  %s1001_s3 = inlined_call_operand.vmem [shape: s32[8,1], index: 3, kind: input, shape index: {}]   ;;  %s1002_s4 = inlined_call_operand.vmem [shape: s32[8,1], index: 4, kind: input, shape index: {}]   ;;  %s1003_s5 = inlined_call_operand.vmem [shape: f32[8,1], index: 5, kind: output, shape index: {0}]   ;;  %s1004_s6 = inlined_call_operand.vmem [shape: s32[8,1], index: 6, kind: output, shape index: {1}]  }
   0x1   :  { %14 = vsyncpa [#allocation10 + $0x1], 0  ;;  %s857_s21 = smov 0   ;;  %s859_s22 = smov 0  }
   0x2   :  { %s861_s23 = smov 0   ;;  %s863_s24 = smov 0  }
   0x3   :  { %s865_s25 = smov 0   ;;  %s867_s26 = smov 0  }
   0x4 LB: > { %s643_s27 = sadd.s32 4294967295, %s814_s26   ;;  %s29_s28 = sadd.s32 1, %s810_s25  ;;  %s814_s26 = sphi %s867_s26, %s20_s26   ;;  %s810_s25 = sphi %s865_s25, %s1013_s25   ;;  %s806_s24 = sphi %s863_s24, %s1012_s24   ;;  %s802_s23 = sphi %s861_s23, %s1011_s23   ;;  %s798_s22 = sphi %s859_s22, %s1010_s22   ;;  %s794_s21 = sphi %s857_s21, %s1009_s21  }
   0x5   : > { %p30_p0 = scmp.ge.s32.totalorder %s29_s28, 3  ;;  %s41_s29 = sadd.s32 1, %s802_s23 }
   0x6   : > { %p48_p1 = scmp.ne.s32.totalorder %s802_s23, %s798_s22  ;;  %p49_p2 = scmp.eq.s32.totalorder %s814_s26, 0 }
   0x7   : > { %s1015_s28 = smov (%p30_p0, %s29_s28), 0  ;;  %p54_p4 = scmp.ne.s32.totalorder %s798_s22, %s794_s21 }
   0x8   : > { %p893_p3 = por %p49_p2, %p48_p1  ;;  %s37_s7 = ssub.s32 %s810_s25, %s1015_s28 }
   0x9   : > { %p55_p5 = scmp.eq.s32.totalorder %s643_s27, 0  ;;  %p39_p6 = scmp.eq.s32.totalorder %s37_s7, 0 }
   0xa   : > { %p666_p8 = scmp.lt.s32.totalorder %s814_s26, 3  ;;  %s248_s10 = sand.u32 1, %s802_s23  }
   0xb   : > { %p900_p7 = por %p55_p5, %p54_p4  ;;  %s649_s11 = sshll.u32 %s810_s25, 3 }
   0xc   : > { %s906_s9 = scalar_select %p39_p6, %s802_s23, %s41_s29  }
   0xd   : > { %s648_s12 = sshll.u32 %s248_s10, 3  ;;  %s258_s15 = scalar_lea.hbm %s998_s0, %s649_s11 }
   0xe   : > { %s260_s16 = sshll.u32 %s258_s15, 4  ;;  %s252_s17 = scalar_lea.vmem [#allocation9], %s648_s12  ;;  %s261_s16 = int_to_ptr.hbm [resolvable:$true] %s260_s16 }
   0xf   : > { %s262_s18 = sshll.u32 %s252_s17, 4  ;;  %p663_p9 = pnand %p666_p8, %p893_p3  ;;  %s263_s18 = int_to_ptr.vmem [resolvable:$true] %s262_s18 }
  0x10   : > { %p650_p10 = scmp.ge.s32.totalorder %s814_s26, 1  ;;  %p279_p11 = scmp.lt.s32.totalorder %s814_s26, 4 }
  0x11   : > { %s249_s19 = scalar_lea.sflag [#allocation10], %s248_s10 }
  0x12   : > { %665 = dma.hbm_to_vmem [thread:$0]  (!%p663_p9), %s261_s16, 128, %s263_s18, %s249_s19  }
  0x13   : > { %p280_p12 = pnand %p650_p10, %p279_p11 }
  0x14   : > { %s285_s20 = sand.u32 (!%p280_p12), 1, %s798_s22  }
  0x15   : > { %283 = sbr.rel (%p280_p12) target bundleno = 595 (0x253), region = 40  ;;  %s918_s21 = sshll.u32 (!%p280_p12), %s285_s20, 3 }
  0x16   : > { %s286_s27 = scalar_lea.sflag (!%p280_p12), [#allocation10], %s285_s20  ;;  %s289_s29 = scalar_lea.vmem (!%p280_p12), [#allocation9], %s918_s21 }
  0x1a   : > { %789 = dma.done.wait (%p900_p7), %s286_s27, 128  }
  0x1b   : > { %791 = vsyncadd (%p900_p7), %s286_s27, 4294967168  ;;  %p336_p13 = scmp.lt.s32.totalorder %s806_s24, 2  ;;  %p652_p0 = scmp.ne.s32.totalorder %s806_s24, 0 }
  0x1d   : > { %s927_s30 = scalar_select %p336_p13, %s806_s24, 2 }
  0x1e   : > { %361 = sbr.rel (%p652_p0) target bundleno = 43 (0x2b), region = 48 }
  0x1f   : > { %s338_s11 = scalar_lea.vmem %s999_s1, %s927_s30  ;;  %s341_s14 = scalar_lea.vmem %s1000_s2, %s927_s30 }
  0x23   : > { %vm362_vm0 = vcmask 7168   ;;  %v816_v0 = vmov -inf   ;;  %v369_v1 = vlaneseq  ;;  %v817_v2 = vmov 0.0  }
  0x24   : > { %363 = vst.msk [vmem:[#allocation2] sm:$0xff] %vm362_vm0, %v816_v0  ;;  %v818_v4 = vmov inf   ;;  %v819_v5 = vmov 0  }
  0x25   : > { %364 = vst.msk [vmem:[#allocation3] sm:$0xff] %vm362_vm0, %v817_v2  ;;  %v370_v3 = vand.u32 127, %v369_v1 }
  0x26   : > { %365 = vst.msk [vmem:[#allocation4] sm:$0xff] %vm362_vm0, %v817_v2 }
  0x27   : > { %366 = vst.msk [vmem:[#allocation5] sm:$0xff] %vm362_vm0, %v817_v2 }
  0x28   : > { %367 = vst.msk [vmem:[#allocation6] sm:$0xff] %vm362_vm0, %v818_v4 }
  0x29   : > { %368 = vst.msk [vmem:[#allocation7] sm:$0xff] %vm362_vm0, %v819_v5 }
  0x2a   : > { %371 = vst [vmem:[#allocation8] sm:$0x1] %v370_v3 }
  0x2b PF: > { %v375_v6 = vld [vmem:[%s1001_s3] sm:$0xff]  ;;  %v820_v7 = vmov 0   ;;  %vm414_vm4 = vcmask 7168   ;;  %v821_v41 = vmov 0.0   ;;  %s654_s20 = sshll.u32 %s806_s24, 7  ;;  %p655_p1 = scmp.ne.s32.totalorder %s806_s24, 2 }
  0x2c   : > { %721 = vset.pattern.permute.xlu0 %v820_v7  ;;  %722 = vset.pattern.permute.xlu2 %v820_v7  ;;  %v376_v8 = vld [vmem:[%s1002_s4] sm:$0xff]  ;;  %v411_v47 = vld [vmem:[#allocation3] sm:$0xff]  ;;  %v452_v58 = vstv %s654_s20 }
  0x2d   : > { %379 = vperm.xlu0 %721, %v375_v6   ;;  %v372_v9 = vld [vmem:[%s289_s29] sm:$0xff] }
  0x2e   : > { %v723_v10 = vld [vmem:[%s338_s11] ss:$0 sm:$0xff]  ;;  %v388_v11 = vmul.f32 14.285714, %v372_v9  ;;  %v417_v30 = vld [vmem:[#allocation4] sm:$0xff]  ;;  %v423_v51 = vld [vmem:[#allocation5] sm:$0xff] }
  0x2f   : > { %v724_v14 = vld [vmem:[%s341_s14] ss:$0 sm:$0xff] }
  0x30   : > { %v392_v19 = vld [vmem:[#allocation2] sm:$0xff]  ;;  %v456_v60 = vld [vmem:[#allocation7] sm:$0xff] }
  0x31   : > { %v454_v25 = vld [vmem:[#allocation6] sm:$0xff]  ;;  %v725_v33 = vld [vmem:[#allocation8] ss:$0 sm:$0xff] }
  0x35   : > { %384 = vperm.xlu0 %721, %v376_v8  }
  0x9f   : > { %v380_v12 = vpop.permute.xlu0 %379 }
  0xa0   : > { %vm381_vm1 = vcmp.eq.s32.totalorder %v723_v10, %v380_v12 }
  0xa1   : > { %v389_v13 = vsel %vm381_vm1, %v388_v11, -inf }
  0xa2   : > { %390 = vmax.xlane.f32.xlu1 %v389_v13 }
  0xa7   : > { %v385_v15 = vpop.permute.xlu0 %384 }
  0xa8   : > { %vm386_vm2 = vcmp.eq.s32.totalorder %v724_v14, %v385_v15 }
  0xa9   : > { %vm951_vm3 = vmand %vm381_vm1, %vm386_vm2 }
  0xaa   : > { %v430_v17 = vsel %vm951_vm3, %v388_v11, inf  ;;  %v418_v18 = vsel %vm951_vm3, %v388_v11, 0.0  ;;  %v653_v42 = vsel %vm951_vm3, 1.0, %v821_v41 }
  0xab   : > { %431 = vmin.xlane.f32.xlu1 %v430_v17 }
  0xb3   : > { %419 = vadd.xlane.f32.xlu1 %v418_v18 }
 0x115   : > { %v391_v20 = vpop.xlane.xlu1 %390 }
 0x116   : > { %v393_v21 = vmax.f32 %v392_v19, %v391_v20 }
 0x118   : > { %v397_v22 = vsub.f32 %v392_v19, %v393_v21  ;;  %416 = vst.msk [vmem:[#allocation2] sm:$0xff] %vm414_vm4, %v393_v21  ;;  %vm394_vm5 = vcmp.eq.f32.partialorder %v393_v21, -inf  ;;  %vm396_vm6 = vcmp.eq.f32.partialorder %v392_v19, %v393_v21 }
 0x119   : > { %v395_v23 = vsel %vm394_vm5, 0.0, %v393_v21 }
 0x11a   : > { %v398_v24 = vmul.f32 1.442695, %v397_v22  ;;  %403 = vperm.xlu2 %722, %v395_v23  }
 0x11c   : > { %726 = vpow2.f32 %v398_v24 }
 0x11e   : > { %v432_v26 = vpop.xlane.xlu1 %431 }
 0x11f   : > { %vm455_vm7 = vcmp.lt.f32.partialorder %v432_v26, %v454_v25  ;;  %v459_v27 = vmin.f32 %v454_v25, %v432_v26  ;;  %vm433_vm8 = vcmp.eq.f32.partialorder %v430_v17, %v432_v26 }
 0x120   : > { %v436_v34 = vsel %vm433_vm8, %v725_v33, 128 }
 0x121   : > { %460 = vst.msk [vmem:[#allocation6] sm:$0xff] %vm414_vm4, %v459_v27  ;;  %v438_v35 = vshra.s32 %v436_v34, 16  ;;  %v437_v43 = vand.u32 65535, %v436_v34 }
 0x122   : > { %v727_v28 = vpop.eup %726 }
 0x123   : > { %v400_v29 = vsel %vm396_vm6, 1.0, %v727_v28  ;;  %v440_v36 = vcvt.s32.f32 %v438_v35  ;;  %v439_v45 = vcvt.s32.f32 %v437_v43 }
 0x124   : > { %v412_v48 = vmul.f32 %v411_v47, %v400_v29 }
 0x126   : > { %v420_v31 = vpop.xlane.xlu1 %419 }
 0x127   : > { %v421_v32 = vadd.f32 %v420_v31, %v417_v30 }
 0x129   : > { %422 = vst.msk [vmem:[#allocation4] sm:$0xff] %vm414_vm4, %v421_v32 }
 0x143   : > { %441 = vmin.xlane.f32.xlu2 %v440_v36 }
 0x174   : > { %v404_v37 = vpop.permute.xlu2 %403 }
 0x175   : > { %v406_v38 = vsub.f32 %v389_v13, %v404_v37 }
 0x177   : > { %v407_v39 = vmul.f32 1.442695, %v406_v38 }
 0x179   : > { %728 = vpow2.f32 %v407_v39 }
 0x17f   : > { %v729_v40 = vpop.eup %728 }
 0x180   : > { %409 = vadd.xlane.f32.xlu1 %v729_v40 }
 0x188   : > { %426 = vadd.xlane.f32.xlu1 %v653_v42 }
 0x1b6   : > { %v442_v44 = vpop.xlane.xlu2 %441 }
 0x1b7   : > { %vm443_vm9 = vcmp.eq.f32.partialorder %v440_v36, %v442_v44  ;;  %v448_v54 = vcvt.f32.s32 %v442_v44 }
 0x1b8   : > { %v444_v46 = vsel %vm443_vm9, %v439_v45, inf }
 0x1b9   : > { %445 = vmin.xlane.f32.xlu0 %v444_v46  ;;  %v449_v56 = vshll.u32 %v448_v54, 16 }
 0x1f3   : > { %v410_v49 = vpop.xlane.xlu1 %409 }
 0x1f4   : > { %v413_v50 = vadd.f32 %v412_v48, %v410_v49 }
 0x1f6   : > { %415 = vst.msk [vmem:[#allocation3] sm:$0xff] %vm414_vm4, %v413_v50 }
 0x1fb   : > { %v427_v52 = vpop.xlane.xlu1 %426 }
 0x1fc   : > { %v428_v53 = vadd.f32 %v427_v52, %v423_v51 }
 0x1fe   : > { %429 = vst.msk [vmem:[#allocation5] sm:$0xff] %vm414_vm4, %v428_v53 }
 0x22c   : > { %v446_v55 = vpop.xlane.xlu0 %445 }
 0x22d   : > { %v447_v57 = vcvt.f32.s32 %v446_v55 }
 0x22f   : > { %v450_v59 = vadd.s32 %v449_v56, %v447_v57 }
 0x230   : > { %464 = sbr.rel (%p655_p1) target bundleno = 595 (0x253), region = 52 }
 0x231   : > { %v453_v61 = vadd.s32 %v452_v58, %v450_v59 }
 0x233   : > { %v457_v62 = vsel %vm455_vm7, %v453_v61, %v456_v60 }
 0x234   : > { %458 = vst.msk [vmem:[#allocation7] sm:$0xff] %vm414_vm4, %v457_v62 }
 0x235   : > { %v465_v63 = vld [vmem:[#allocation5] sm:$0xff]  ;;  %v486_v2 = vld [vmem:[#allocation3] sm:$0xff]  ;;  %v468_v12 = vld [vmem:[#allocation4] sm:$0xff] }
 0x236   : > { %vm466_vm10 = vcmp.gt.f32.partialorder %v465_v63, 0.0  ;;  %v484_v15 = vld [vmem:[#allocation2] sm:$0xff] }
 0x237   : > { %v467_v1 = vsel %vm466_vm10, %v465_v63, 1.0 }
 0x238   : > { %730 = vrcp.f32 %v467_v1  ;;  %v480_v5 = vand.u32 2147483648, %v467_v1  ;;  %vm474_vm11 = vweird.f32 %v467_v1  ;;  %v478_v7 = vand.u32 2147483647, %v467_v1 }
 0x239   : > { %732 = vlog2.f32 %v486_v2 }
 0x23a   : > { %v481_v9 = vor.u32 1.1754944e-38, %v480_v5  ;;  %vm479_vm14 = vcmp.eq.f32.partialorder %v478_v7, 8.507059e+37 }
 0x23b   : > { %v493_v0 = vld [vmem:[#allocation7] sm:$0xff] }
 0x23c   : > { %494 = vst.msk [vmem:[%s1004_s6] sm:$0xff] %vm414_vm4, %v493_v0 }
 0x23e   : > { %v731_v3 = vpop.eup %730 }
 0x23f   : > { %v470_v4 = vmul.f32 %v731_v3, %v467_v1  ;;  %vm475_vm12 = vweird.f32 %v731_v3  ;;  %v733_v11 = vpop.eup %732 }
 0x240   : > { %vm476_vm13 = vmor %vm474_vm11, %vm475_vm12  ;;  %v488_v17 = vmul.f32 0.6931472, %v733_v11 }
 0x241   : > { %v471_v6 = vsub.f32 1.0, %v470_v4 }
 0x243   : > { %v472_v8 = vmul.f32 %v731_v3, %v471_v6 }
 0x245   : > { %v473_v10 = vadd.f32 %v731_v3, %v472_v8 }
 0x247   : > { %v477_v13 = vsel %vm476_vm13, %v731_v3, %v473_v10 }
 0x248   : > { %v482_v14 = vsel %vm479_vm14, %v481_v9, %v477_v13 }
 0x249   : > { %v483_v16 = vmul.f32 %v482_v14, %v468_v12 }
 0x24b   : > { %v485_v18 = vsub.f32 %v483_v16, %v484_v15 }
 0x24d   : > { %v489_v19 = vsub.f32 %v485_v18, %v488_v17 }
 0x24f   : > { %v490_v20 = vmul.f32 -1.0, %v489_v19 }
 0x251   : > { %v491_v21 = vsel %vm466_vm10, %v490_v20, 0.0 }
 0x252   : > { %492 = vst.msk [vmem:[%s1003_s5] sm:$0xff] %vm414_vm4, %v491_v21 }
 0x253 PF: > { %s20_s26 = sadd.s32 1, %s814_s26   ;;  %s1009_s21 = smov %s798_s22 }
 0x254   : > { %p17_p2 = scmp.ge.s32.totalorder %s20_s26, 5   ;;  %s1010_s22 = smov %s802_s23 }
 0x255   : > { %s1011_s23 = smov %s906_s9  ;;  %s1012_s24 = smov %s810_s25 }
 0x256   : > { %s1013_s25 = smov %s1015_s28  ;;  %19 = sbr.rel (!%p17_p2) target bundleno = 4 (0x4), region = 112 }
 0x25b   :  { %528 = vsyncpa [#allocation10], 1 }
 0x25c   :  { %530 = vsyncpa [#allocation10 + $0x1], 1 }

</bundles_post_ra>
